<compile_context>
chip_gen: v5e
topology: v5e:2x2
jax: 0.10.0
libtpu: 0.0.40
codegen_flags: <defaults>
</compile_context>

<pallas_src>
import functools

import jax
import jax.numpy as jnp
from jax.experimental import pallas as pl
from jax.experimental.pallas import tpu as pltpu


def _mil_kernel(bags_ref, w_enc_ref, b_enc_ref, w_head_ref, b_head_ref,
                out_ref, acc_ref, *, n_patches):
    """bags_ref: (TILE_B, TILE_N, F) tile; acc_ref: (TILE_B, F) f32 scratch."""
    nk = pl.program_id(1)

    @pl.when(nk == 0)
    def _init():
        acc_ref[...] = jnp.zeros_like(acc_ref)

    # Partial sum over the patch axis of this tile, accumulated in f32.
    acc_ref[...] += jnp.sum(bags_ref[...].astype(jnp.float32), axis=1)

    @pl.when(nk == pl.num_programs(1) - 1)
    def _finalize():
        # mean over patches; bias added AFTER pooling (mean commutes with it).
        pooled = acc_ref[...] * (1.0 / n_patches)                      # (TB, F)
        emb = jnp.dot(pooled, w_enc_ref[...],
                      preferred_element_type=jnp.float32) + b_enc_ref[...]   # (TB, Z)
        scores = jnp.dot(emb, w_head_ref[...],
                         preferred_element_type=jnp.float32) + b_head_ref[...]  # (TB, n_out)
        out_ref[...] = scores.astype(out_ref.dtype)


def _pick_tile(dim, max_tile, align=8):
    """Largest t dividing `dim` with t <= max_tile and (t == dim or t % align == 0)."""
    if dim <= max_tile:
        return dim
    for t in range(max_tile, 0, -1):
        if dim % t == 0 and t % align == 0:
            return t
    return dim  # no aligned divisor -> process the full dim in one tile


def linear_evaluation_mil_forward(bags, w_enc, b_enc, w_head, b_head,
                                  *, tile_b=None, tile_n=None):
    """bags: (B, N, F); w_enc: (F, Z); b_enc: (1, Z); w_head: (Z, n_out); b_head: (1, n_out)."""
    B, N, F = bags.shape
    Z = w_enc.shape[1]
    n_out = w_head.shape[1]
    itemsize = jnp.dtype(bags.dtype).itemsize

    # Batch many bags per grid step so the MXU sees >=128 LHS rows when B allows it.
    if tile_b is None:
        tile_b = _pick_tile(B, 256)
    # Tile N so a double-buffered bag tile stays well under the VMEM budget
    # (relevant for v7x's 64 MiB VMEM / 32 MiB scoped default at realistic N, F).
    if tile_n is None:
        budget_rows = max(8, (8 * 1024 * 1024) // max(1, 2 * tile_b * F * itemsize))
        tile_n = _pick_tile(N, int(budget_rows))

    grid = (B // tile_b, N // tile_n)

    # Advisory cost estimate so XLA schedules neighbours around the call sensibly.
    flops = 2 * B * N * F + 2 * B * F * Z + 2 * B * Z * n_out
    bytes_accessed = (bags.size * itemsize
                      + w_enc.size * jnp.dtype(w_enc.dtype).itemsize
                      + b_enc.size * jnp.dtype(b_enc.dtype).itemsize
                      + w_head.size * jnp.dtype(w_head.dtype).itemsize
                      + b_head.size * jnp.dtype(b_head.dtype).itemsize
                      + B * n_out * itemsize)

    kernel = functools.partial(_mil_kernel, n_patches=N)

    return pl.pallas_call(
        kernel,
        out_shape=jax.ShapeDtypeStruct((B, n_out), bags.dtype),
        grid_spec=pltpu.PrefetchScalarGridSpec(
            num_scalar_prefetch=0,
            grid=grid,
            in_specs=[
                pl.BlockSpec((tile_b, tile_n, F), lambda b, k: (b, k, 0)),  # bag tile
                pl.BlockSpec((F, Z), lambda b, k: (0, 0)),                  # encoder weight
                pl.BlockSpec((1, Z), lambda b, k: (0, 0)),                  # encoder bias
                pl.BlockSpec((Z, n_out), lambda b, k: (0, 0)),              # head weight
                pl.BlockSpec((1, n_out), lambda b, k: (0, 0)),              # head bias
            ],
            out_specs=pl.BlockSpec((tile_b, n_out), lambda b, k: (b, 0)),
            scratch_shapes=[pltpu.VMEM((tile_b, F), jnp.float32)],
        ),
        compiler_params=pltpu.CompilerParams(
            dimension_semantics=("parallel", "arbitrary")),
        cost_estimate=pl.CostEstimate(
            flops=int(flops), transcendentals=0,
            bytes_accessed=int(bytes_accessed)),
    )(bags, w_enc, b_enc, w_head, b_head)


def init_params(key, n_feats, n_out, z_dim):
    """Xavier-normal weights (matching nn.init.xavier_normal_), zero biases."""
    k_enc, k_head = jax.random.split(key)
    std_enc = (2.0 / (n_feats + z_dim)) ** 0.5
    std_head = (2.0 / (z_dim + n_out)) ** 0.5
    # stored as (in, out): transpose of torch's (out, in) weight
    w_enc = std_enc * jax.random.normal(k_enc, (n_feats, z_dim), dtype=jnp.float32)
    b_enc = jnp.zeros((1, z_dim), dtype=jnp.float32)
    w_head = std_head * jax.random.normal(k_head, (z_dim, n_out), dtype=jnp.float32)
    b_head = jnp.zeros((1, n_out), dtype=jnp.float32)
    return w_enc, b_enc, w_head, b_head


def _reference(bags, w_enc, b_enc, w_head, b_head):
    """Plain-JAX replica of the PyTorch forward (per-patch linear, then mean)."""
    B, N, F = bags.shape
    emb = bags.reshape(-1, F) @ w_enc + b_enc            # (B*N, Z)
    pooled = emb.reshape(B, N, -1).mean(axis=1)          # (B, Z)
    return pooled @ w_head + b_head                      # (B, n_out)


if __name__ == "__main__":
    key = jax.random.PRNGKey(0)

    # --- small demo shapes consistent with the module's forward ---
    B, N, F, Z, NOUT = 2, 8, 32, 32, 4
    k_bags, k_params, k_bags2, k_params2 = jax.random.split(key, 4)
    bags = jax.random.normal(k_bags, (B, N, F), dtype=jnp.float32)
    w_enc, b_enc, w_head, b_head = init_params(k_params, F, NOUT, Z)

    scores = linear_evaluation_mil_forward(bags, w_enc, b_enc, w_head, b_head)
    scores = jax.block_until_ready(scores)
    scores_ref = _reference(bags, w_enc, b_enc, w_head, b_head)
    assert scores.shape == (B, NOUT)
    assert jnp.allclose(scores, scores_ref, atol=1e-4, rtol=1e-4)

    # --- second check exercising the tiled (multi-step) reduction path ---
    B2, N2, F2, Z2, NOUT2 = 16, 64, 128, 64, 8
    bags2 = jax.random.normal(k_bags2, (B2, N2, F2), dtype=jnp.float32)
    w_enc2, b_enc2, w_head2, b_head2 = init_params(k_params2, F2, NOUT2, Z2)
    scores2 = linear_evaluation_mil_forward(
        bags2, w_enc2, b_enc2, w_head2, b_head2, tile_b=8, tile_n=16)
    scores2 = jax.block_until_ready(scores2)
    scores2_ref = _reference(bags2, w_enc2, b_enc2, w_head2, b_head2)
    assert scores2.shape == (B2, NOUT2)
    assert jnp.allclose(scores2, scores2_ref, atol=1e-4, rtol=1e-4)

    print("KERNEL_OK")
</pallas_src>

<mosaic_0001>
module attributes {stable_mosaic.version = 11 : i64} {
  func.func @_mil_kernel(%arg0: i32, %arg1: i32, %arg2: memref<2x8x32xf32, #tpu.memory_space<vmem>>, %arg3: memref<32x32xf32, #tpu.memory_space<vmem>>, %arg4: memref<1x32xf32, #tpu.memory_space<vmem>>, %arg5: memref<32x4xf32, #tpu.memory_space<vmem>>, %arg6: memref<1x4xf32, #tpu.memory_space<vmem>>, %arg7: memref<2x4xf32, #tpu.memory_space<vmem>>, %arg8: memref<2x32xf32, #tpu.memory_space<vmem>>) attributes {dimension_semantics = [#tpu.dimension_semantics<parallel>, #tpu.dimension_semantics<arbitrary>], iteration_bounds = array<i64: 1, 1>, scalar_prefetch = 0 : i64, scratch_operands = 1 : i64, tpu.core_type = #tpu.core_type<tc>, window_params = [{transform_indices = @transform_0, window_bounds = array<i64: 2, 8, 32>}, {pipeline_mode = #tpu.pipeline_mode<synchronous>, transform_indices = @transform_1, window_bounds = array<i64: 32, 32>}, {pipeline_mode = #tpu.pipeline_mode<synchronous>, transform_indices = @transform_2, window_bounds = array<i64: 1, 32>}, {pipeline_mode = #tpu.pipeline_mode<synchronous>, transform_indices = @transform_3, window_bounds = array<i64: 32, 4>}, {pipeline_mode = #tpu.pipeline_mode<synchronous>, transform_indices = @transform_4, window_bounds = array<i64: 1, 4>}, {transform_indices = @transform_5, window_bounds = array<i64: 2, 4>}]} {
    %c0_i32 = arith.constant 0 : i32
    %0 = arith.cmpi eq, %arg1, %c0_i32 : i32
    %1 = arith.extui %0 : i1 to i32
    %c0_i32_0 = arith.constant 0 : i32
    %2 = arith.cmpi ne, %1, %c0_i32_0 : i32
    scf.if %2 {
      %cst_9 = arith.constant 0.000000e+00 : f32
      %11 = vector.broadcast %cst_9 : f32 to vector<2x32xf32>
      %c0_10 = arith.constant 0 : index
      %c0_11 = arith.constant 0 : index
      %12 = vector.load %arg8[%c0_10, %c0_11] : memref<2x32xf32, #tpu.memory_space<vmem>>, vector<2x32xf32>
      tpu.vector_store %arg8[%c0_10, %c0_11], %11 {strides = array<i32>} : memref<2x32xf32, #tpu.memory_space<vmem>>, vector<2x32xf32>,
    } else {
    }
    %c0 = arith.constant 0 : index
    %c0_1 = arith.constant 0 : index
    %3 = vector.load %arg8[%c0, %c0_1] : memref<2x32xf32, #tpu.memory_space<vmem>>, vector<2x32xf32>
    %c0_2 = arith.constant 0 : index
    %c0_3 = arith.constant 0 : index
    %c0_4 = arith.constant 0 : index
    %4 = vector.load %arg2[%c0_2, %c0_3, %c0_4] : memref<2x8x32xf32, #tpu.memory_space<vmem>>, vector<2x8x32xf32>
    %cst = arith.constant dense<0.000000e+00> : vector<2x32xf32>
    %5 = vector.multi_reduction <add>, %4, %cst [1] : vector<2x8x32xf32> to vector<2x32xf32>
    %6 = arith.addf %3, %5 : vector<2x32xf32>
    %c0_5 = arith.constant 0 : index
    %c0_6 = arith.constant 0 : index
    %7 = vector.load %arg8[%c0_5, %c0_6] : memref<2x32xf32, #tpu.memory_space<vmem>>, vector<2x32xf32>
    tpu.vector_store %arg8[%c0_5, %c0_6], %6 {strides = array<i32>} : memref<2x32xf32, #tpu.memory_space<vmem>>, vector<2x32xf32>,
    %c0_i32_7 = arith.constant 0 : i32
    %8 = arith.cmpi eq, %arg1, %c0_i32_7 : i32
    %9 = arith.extui %8 : i1 to i32
    %c0_i32_8 = arith.constant 0 : i32
    %10 = arith.cmpi ne, %9, %c0_i32_8 : i32
    scf.if %10 {
      %c0_9 = arith.constant 0 : index
      %c0_10 = arith.constant 0 : index
      %11 = vector.load %arg8[%c0_9, %c0_10] : memref<2x32xf32, #tpu.memory_space<vmem>>, vector<2x32xf32>
      %cst_11 = arith.constant 1.250000e-01 : f32
      %12 = vector.broadcast %cst_11 : f32 to vector<2x32xf32>
      %13 = arith.mulf %11, %12 : vector<2x32xf32>
      %c0_12 = arith.constant 0 : index
      %c0_13 = arith.constant 0 : index
      %14 = vector.load %arg3[%c0_12, %c0_13] : memref<32x32xf32, #tpu.memory_space<vmem>>, vector<32x32xf32>
      %cst_14 = arith.constant dense<0.000000e+00> : vector<2x32xf32>
      %15 = tpu.matmul %13, %14, %cst_14 {dimension_numbers = #tpu.dot_dimension_numbers<[1], [0], [0], [1], [0, 0, 1, 1], [], []>} : vector<2x32xf32>, vector<32x32xf32>, vector<2x32xf32> -> vector<2x32xf32>
      %c0_15 = arith.constant 0 : index
      %c0_16 = arith.constant 0 : index
      %16 = vector.load %arg4[%c0_15, %c0_16] : memref<1x32xf32, #tpu.memory_space<vmem>>, vector<1x32xf32>
      %17 = vector.broadcast %16 : vector<1x32xf32> to vector<2x32xf32>
      %18 = arith.addf %15, %17 : vector<2x32xf32>
      %c0_17 = arith.constant 0 : index
      %c0_18 = arith.constant 0 : index
      %19 = vector.load %arg5[%c0_17, %c0_18] : memref<32x4xf32, #tpu.memory_space<vmem>>, vector<32x4xf32>
      %cst_19 = arith.constant dense<0.000000e+00> : vector<2x4xf32>
      %20 = tpu.matmul %18, %19, %cst_19 {dimension_numbers = #tpu.dot_dimension_numbers<[1], [0], [0], [1], [0, 0, 1, 1], [], []>} : vector<2x32xf32>, vector<32x4xf32>, vector<2x4xf32> -> vector<2x4xf32>
      %c0_20 = arith.constant 0 : index
      %c0_21 = arith.constant 0 : index
      %21 = vector.load %arg6[%c0_20, %c0_21] : memref<1x4xf32, #tpu.memory_space<vmem>>, vector<1x4xf32>
      %22 = vector.broadcast %21 : vector<1x4xf32> to vector<2x4xf32>
      %23 = arith.addf %20, %22 : vector<2x4xf32>
      %c0_22 = arith.constant 0 : index
      %c0_23 = arith.constant 0 : index
      %24 = vector.load %arg7[%c0_22, %c0_23] : memref<2x4xf32, #tpu.memory_space<vmem>>, vector<2x4xf32>
      tpu.vector_store %arg7[%c0_22, %c0_23], %23 {strides = array<i32>} : memref<2x4xf32, #tpu.memory_space<vmem>>, vector<2x4xf32>,
    } else {
    }
    return
  }
  func.func @transform_0(%arg0: i32, %arg1: i32) -> (i32, i32, i32) {
    %c0_i32 = arith.constant 0 : i32
    %c0_i32_0 = arith.constant 0 : i32
    return %arg0, %arg1, %c0_i32 : i32, i32, i32
  }
  func.func @transform_1(%arg0: i32, %arg1: i32) -> (i32, i32) {
    %c0_i32 = arith.constant 0 : i32
    %c0_i32_0 = arith.constant 0 : i32
    %c0_i32_1 = arith.constant 0 : i32
    return %c0_i32, %c0_i32_0 : i32, i32
  }
  func.func @transform_2(%arg0: i32, %arg1: i32) -> (i32, i32) {
    %c0_i32 = arith.constant 0 : i32
    %c0_i32_0 = arith.constant 0 : i32
    %c0_i32_1 = arith.constant 0 : i32
    return %c0_i32, %c0_i32_0 : i32, i32
  }
  func.func @transform_3(%arg0: i32, %arg1: i32) -> (i32, i32) {
    %c0_i32 = arith.constant 0 : i32
    %c0_i32_0 = arith.constant 0 : i32
    %c0_i32_1 = arith.constant 0 : i32
    return %c0_i32, %c0_i32_0 : i32, i32
  }
  func.func @transform_4(%arg0: i32, %arg1: i32) -> (i32, i32) {
    %c0_i32 = arith.constant 0 : i32
    %c0_i32_0 = arith.constant 0 : i32
    %c0_i32_1 = arith.constant 0 : i32
    return %c0_i32, %c0_i32_0 : i32, i32
  }
  func.func @transform_5(%arg0: i32, %arg1: i32) -> (i32, i32) {
    %c0_i32 = arith.constant 0 : i32
    %c0_i32_0 = arith.constant 0 : i32
    return %arg0, %c0_i32 : i32, i32
  }
}

</mosaic_0001>

<bundles_post_ra>
// kernel: tpu_custom_call.1
= control target key start
LH: loop header
LB: loop body
LE: loop exit
PB: predicated region body
PF: predicated region fallthrough
CT: control target
= control target key end

     0   :  { %10 = vsyncpa [#allocation4], 0  ;;  %s293_s0 = inlined_call_operand.hbm [shape: f32[2,8,32], index: 0, kind: input, shape index: {}]   ;;  %s294_s1 = inlined_call_operand.vmem [shape: f32[32,32], index: 1, kind: input, shape index: {}]   ;;  %s295_s2 = inlined_call_operand.vmem [shape: f32[1,32], index: 2, kind: input, shape index: {}]   ;;  %s296_s3 = inlined_call_operand.vmem [shape: f32[32,4], index: 3, kind: input, shape index: {}]   ;;  %s297_s4 = inlined_call_operand.vmem [shape: f32[1,4], index: 4, kind: input, shape index: {}]   ;;  %s298_s5 = inlined_call_operand.hbm [shape: f32[2,4], index: 5, kind: output, shape index: {}]  }
   0x1   :  { %11 = vsyncpa [#allocation5], 0  ;;  %s16_s20 = sshll.u32 %s293_s0, 4  ;;  %s216_s21 = smov [#allocation3]   ;;  %s17_s20 = int_to_ptr.hbm [resolvable:$true] %s16_s20 }
   0x2   :  { %s18_s22 = sshll.u32 %s216_s21, 4  ;;  %s217_s23 = smov 128   ;;  %s19_s22 = int_to_ptr.vmem [resolvable:$true] %s18_s22 }
   0x3   :  { %s218_s24 = smov 8  }
   0x4   :  { %24 = dma.hbm_to_vmem [thread:$0]  %s17_s20, 256, %s19_s22, [#allocation4], %s217_s23, %s217_s23, %s218_s24  }
   0x5   :  { %212 = dma.done.wait [#allocation4], 256  }
   0x6   :  { %213 = vsyncadd [#allocation4], 4294967040  ;;  %vm41_vm0 = vcmask 254976   ;;  %v219_v0 = vmov 0.0   ;;  %vm46_vm1 = vcmask 261120   ;;  %v77_v1 = vld [vmem:[%s294_s1 + $0x18] sm:$0xff] }
   0x7   :  { %42 = vst.msk [vmem:[#allocation2] sm:$0x3] %vm41_vm0, %v219_v0  ;;  %v76_v2 = vld [vmem:[%s294_s1 + $0x10] sm:$0xff]  ;;  %97 = vmatpush.msra.mxu0 %v77_v1  ;;  %v75_v3 = vld [vmem:[%s294_s1 + $0x8] sm:$0xff]  ;;  %v108_v7 = vld [vmem:[%s296_s3 + $0x18] sm:$0xff]  ;;  %vm63_vm2 = vcmask 1041409  }
   0x8   :  { %v44_v4 = vld [vmem:[#allocation3] sm:$0xff]  ;;  %v45_v5 = vld [vmem:[#allocation3 + $0x8] sm:$0xff]  ;;  %128 = vmatpush.msra.mxu1 %v108_v7  ;;  %v162_v30 = vld [vmem:[%s295_s2] ss:$0 sm:$0xff]  ;;  %s220_s18 = smov [#allocation6]   ;;  %s145_s22 = sshll.u32 %s298_s5, 4  ;;  %s146_s22 = int_to_ptr.hbm [resolvable:$true] %s145_s22 }
   0x9   :  { %v47_v6 = vsel %vm46_vm1, %v44_v4, 0.0  ;;  %v107_v8 = vld [vmem:[%s296_s3 + $0x10] sm:$0xff]  ;;  %98 = vmatpush.msra.mxu0 %v76_v2  ;;  %v54_v10 = vsel %vm46_vm1, %v45_v5, 0.0  ;;  %v74_v11 = vld [vmem:[%s294_s1] sm:$0xff]  ;;  %v106_v28 = vld [vmem:[%s296_s3 + $0x8] sm:$0xff]  ;;  %s143_s19 = sshll.u32 %s220_s18, 4  ;;  %s144_s19 = int_to_ptr.vmem [resolvable:$true] %s143_s19 }
   0xa   :  { %v48_v9 = vrot.slane %v47_v6, 4  ;;  %v55_v12 = vrot.slane %v54_v10, 4  ;;  %129 = vmatpush.msra.mxu1 %v107_v8  ;;  %v105_v29 = vld [vmem:[%s296_s3] sm:$0xff]  ;;  %vm136_vm3 = vcmask 25600  }
   0xb   :  { %99 = vmatpush.msra.mxu0 %v75_v3  ;;  %v163_v33 = vld [vmem:[%s297_s4] ss:$0 sm:$0xff] }
   0xc   :  { %v49_v13 = vadd.f32 %v48_v9, %v47_v6  ;;  %v56_v14 = vadd.f32 %v55_v12, %v54_v10  ;;  %130 = vmatpush.msra.mxu1 %v106_v28 }
   0xd   :  { %100 = vmatpush.msra.mxu0 %v74_v11 }
   0xe   :  { %v50_v15 = vrot.slane %v49_v13, 2  ;;  %v57_v16 = vrot.slane %v56_v14, 2  ;;  %v43_v22 = vld [vmem:[#allocation2] sm:$0x3]  ;;  %131 = vmatpush.msra.mxu1 %v105_v29 }
  0x10   :  { %v51_v17 = vadd.f32 %v50_v15, %v49_v13  ;;  %v58_v18 = vadd.f32 %v57_v16, %v56_v14 }
  0x12   :  { %v52_v19 = vrot.slane %v51_v17, 1  ;;  %v59_v20 = vrot.slane %v58_v18, 1 }
  0x14   :  { %v53_v21 = vadd.f32 %v52_v19, %v51_v17  ;;  %v60_v23 = vadd.f32 %v59_v20, %v58_v18 }
  0x16   :  { %v64_v24 = vsel %vm63_vm2, %v60_v23, %v53_v21 }
  0x17   :  { %v66_v25 = vadd.f32 %v64_v24, %v43_v22 }
  0x19   :  { %68 = vst.msk [vmem:[#allocation2] sm:$0x3] %vm41_vm0, %v66_v25 }
  0x20   :  { %v72_v26 = vld [vmem:[#allocation2] sm:$0x3] }
  0x21   :  { %v73_v27 = vmul.f32 0.125, %v72_v26 }
  0x23   :  { %155 = vmatmul.msk.f32.vlgmr.msra.gmra.mxu0 %vm46_vm1, %v73_v27 }
  0xa0   :  { %v102_v31 = vpop.f32.mrf.mxu0 }
  0xa1   :  { %v103_v32 = vadd.f32 %v162_v30, %v102_v31 }
  0xa3   :  { %156 = vmatmul.msk.f32.vlgmr.msra.gmra.mxu1 %vm46_vm1, %v103_v32 }
 0x120   :  { %v133_v34 = vpop.f32.mrf.mxu1 }
 0x121   :  { %v134_v35 = vadd.f32 %v163_v33, %v133_v34 }
 0x123   :  { %137 = vst.msk [vmem:[#allocation6] sm:$0x3] %vm136_vm3, %v134_v35 }
 0x124   :  { %148 = dma.vmem_to_hbm [thread:$0]  %s144_s19, 32, %s146_s22, [#allocation5]  }
 0x125   :  { %214 = dma.done.wait [#allocation5], 32  }
 0x126   :  { %215 = vsyncadd [#allocation5], 4294967264 }
 0x127   :  { %153 = vsyncpa [#allocation4], 1 }
 0x128   :  { %154 = vsyncpa [#allocation5], 1 }

</bundles_post_ra>
